<compile_context>
chip_gen: v7x
topology: tpu7x:2x2x1
jax: 0.10.0
libtpu: 0.0.40
codegen_flags: <defaults>
</compile_context>

<pallas_src>
import jax
import jax.numpy as jnp
from jax.experimental import pallas as pl
from jax.experimental.pallas import tpu as pltpu


def _round_up(x, m):
    return ((x + m - 1) // m) * m


def _vmem_limit_bytes():
    """Best-effort physical VMEM query; conservative fallback (v7x: 64 MiB/TC)."""
    phys = 64 * 1024 * 1024
    try:
        phys = int(pltpu.get_tpu_info().vmem_capacity_bytes)
    except Exception:
        pass
    # Leave headroom for compiler-internal scratch; cap at 96 MiB.
    return min(phys * 3 // 4, 96 * 1024 * 1024)


def _device_kind():
    try:
        return jax.devices()[0].device_kind.lower()
    except Exception:
        return ""


def _choose_tile(dim, cap, granule=128):
    """Return (padded_dim, tile).

    padded_dim = round_up(dim, granule) (minimal padding -- this kernel is
    HBM-bandwidth bound, so wasted padded traffic is the first-order cost).
    tile is the largest granule-multiple that divides padded_dim and is <= cap.
    """
    dim_p = _round_up(max(dim, 1), granule)
    if dim_p <= cap:
        return dim_p, dim_p
    m = dim_p // granule
    tile = granule
    for d in range(m, 0, -1):
        if m % d == 0 and d * granule <= cap:
            tile = d * granule
            break
    return dim_p, tile


def _make_kernel(tk, x_resident):
    def kernel(adj_ref, x_ref, o_ref):
        # Grid = (i, j, k); reduction axis k is innermost ("arbitrary").
        k = pl.program_id(2)

        @pl.when(k == 0)
        def _():
            o_ref[...] = jnp.zeros_like(o_ref)

        if x_resident:
            # Full (Kp, tn) x slab lives in VMEM; take the k-th row band.
            start = pl.multiple_of(k * tk, 128)
            x_blk = x_ref[pl.ds(start, tk), :]
        else:
            x_blk = x_ref[...]

        # f32 operands streamed from HBM; cast to bf16 in-register for the
        # fast MXU path, accumulate in f32 directly into the output block
        # (which is resident across the k axis).
        o_ref[...] += jnp.dot(
            adj_ref[...].astype(jnp.bfloat16),
            x_blk.astype(jnp.bfloat16),
            preferred_element_type=jnp.float32,
        )

    return kernel


def graph_conv(x, adj):
    """Pallas TPU kernel computing adj @ x (GraphConv.forward semantics)."""
    N, K = adj.shape
    K2, F = x.shape
    assert K == K2, "adj columns must match x rows"

    vmem_limit = _vmem_limit_bytes()
    two_tensorcores = "v7" in _device_kind()

    # --- Tile selection ------------------------------------------------------
    # Caps chosen so worst-case double-buffered tiles stay well under the VMEM
    # budget on every generation (v7x has only 64 MiB per TensorCore).
    TM_CAP, TK_CAP, TN_CAP = 512, 1024, 1024

    Np, tm = _choose_tile(N, TM_CAP)
    Kp, tk = _choose_tile(K, TK_CAP)
    Fp, tn = _choose_tile(F, TN_CAP)

    # v7x only: ensure >= 2 row blocks so the "parallel" i axis can be sharded
    # across the two TensorCores.  Single-TC v5e/v6e keep the larger tile
    # (splitting there only adds grid overhead / halves MXU row fill).
    if two_tensorcores and Np // tm < 2 and Np >= 512:
        for g in (256, 128):
            cands = [t for t in range(g, Np // 2 + 1, g) if Np % t == 0]
            if cands:
                tm = max(cands)
                break

    n_i, n_j, n_k = Np // tm, Fp // tn, Kp // tk

    # --- x placement ----------------------------------------------------------
    # With a single j block, keeping the whole (Kp, Fp) x slab resident in VMEM
    # means x is DMA'd exactly once (not once per row block) and adj is
    # streamed exactly once: total HBM traffic ~ 4*(N*K + K*F + N*F) bytes.
    adj_buf_bytes = 2 * tm * tk * 4          # double-buffered adj tiles (f32)
    out_buf_bytes = 2 * tm * tn * 4          # double-buffered out tiles (f32)
    x_slab_bytes = 2 * Kp * Fp * 4           # conservative (assume 2 buffers)
    x_resident = (
        n_j == 1
        and adj_buf_bytes + out_buf_bytes + x_slab_bytes
        <= vmem_limit - (4 << 20)
    )

    # --- Zero-pad only when needed (zeros contribute nothing to the sums) ----
    adj_c = adj if (Np, Kp) == (N, K) else jnp.pad(adj, ((0, Np - N), (0, Kp - K)))
    x_c = x if (Kp, Fp) == (K, F) else jnp.pad(x, ((0, Kp - K), (0, Fp - F)))

    if x_resident:
        x_spec = pl.BlockSpec((Kp, tn), lambda i, j, k: (0, j))
    else:
        x_spec = pl.BlockSpec((tk, tn), lambda i, j, k: (k, j))

    out = pl.pallas_call(
        _make_kernel(tk, x_resident),
        out_shape=jax.ShapeDtypeStruct((Np, Fp), jnp.float32),
        grid_spec=pltpu.PrefetchScalarGridSpec(
            num_scalar_prefetch=0,
            grid=(n_i, n_j, n_k),
            in_specs=[
                pl.BlockSpec((tm, tk), lambda i, j, k: (i, k)),  # adj tile
                x_spec,                                          # x tile / slab
            ],
            out_specs=pl.BlockSpec((tm, tn), lambda i, j, k: (i, j)),
        ),
        compiler_params=pltpu.CompilerParams(
            dimension_semantics=("parallel", "parallel", "arbitrary"),
            vmem_limit_bytes=vmem_limit,
        ),
    )(adj_c, x_c)

    # Slice off padding.
    if (Np, Fp) != (N, F):
        out = out[:N, :F]
    return out


if __name__ == "__main__":
    key = jax.random.PRNGKey(0)
    k_adj, k_x = jax.random.split(key)

    num_nodes = 256   # N
    feat_dim = 128    # F

    # Deterministic synthetic inputs: dense "adjacency" matrix and node features.
    adj = jax.random.uniform(k_adj, (num_nodes, num_nodes), dtype=jnp.float32)
    x = jax.random.normal(k_x, (num_nodes, feat_dim), dtype=jnp.float32)

    out = graph_conv(x, adj)
    out = jax.block_until_ready(out)

    assert out.shape == (num_nodes, feat_dim)
    assert out.dtype == jnp.float32

    # Reference with matching bf16 operand rounding + f32 accumulation.
    ref_bf16 = jax.lax.dot_general(
        adj.astype(jnp.bfloat16).astype(jnp.float32),
        x.astype(jnp.bfloat16).astype(jnp.float32),
        (((1,), (0,)), ((), ())),
        precision=jax.lax.Precision.HIGHEST,
    )
    assert jnp.allclose(out, ref_bf16, rtol=1e-3, atol=1e-3)

    # Loose sanity check against the full-f32 torch.mm(adj, x) reference
    # (bf16 MXU operands introduce ~1e-2 relative rounding).
    ref_f32 = adj @ x
    assert jnp.allclose(out, ref_f32, rtol=2e-2, atol=2e-1)

    print("KERNEL_OK")
</pallas_src>

<mosaic_0001>
module attributes {stable_mosaic.version = 11 : i64} {
  func.func @kernel(%arg0: i32, %arg1: i32, %arg2: i32, %arg3: memref<256x256xf32, #tpu.memory_space<vmem>>, %arg4: memref<256x128xf32, #tpu.memory_space<vmem>>, %arg5: memref<256x128xf32, #tpu.memory_space<vmem>>) attributes {dimension_semantics = [#tpu.dimension_semantics<parallel>, #tpu.dimension_semantics<parallel>, #tpu.dimension_semantics<arbitrary>], iteration_bounds = array<i64: 1, 1, 1>, scalar_prefetch = 0 : i64, scratch_operands = 0 : i64, tpu.core_type = #tpu.core_type<tc>, window_params = [{transform_indices = @transform_0, window_bounds = array<i64: 256, 256>}, {transform_indices = @transform_1, window_bounds = array<i64: 256, 128>}, {transform_indices = @transform_2, window_bounds = array<i64: 256, 128>}]} {
    %c0_i32 = arith.constant 0 : i32
    %0 = arith.cmpi eq, %arg2, %c0_i32 : i32
    %1 = arith.extui %0 : i1 to i32
    %c0_i32_0 = arith.constant 0 : i32
    %2 = arith.cmpi ne, %1, %c0_i32_0 : i32
    scf.if %2 {
      %cst_7 = arith.constant 0.000000e+00 : f32
      %14 = vector.broadcast %cst_7 : f32 to vector<256x128xf32>
      %c0_8 = arith.constant 0 : index
      %c0_9 = arith.constant 0 : index
      %15 = vector.load %arg5[%c0_8, %c0_9] : memref<256x128xf32, #tpu.memory_space<vmem>>, vector<256x128xf32>
      tpu.vector_store %arg5[%c0_8, %c0_9], %14 {strides = array<i32>} : memref<256x128xf32, #tpu.memory_space<vmem>>, vector<256x128xf32>,
    } else {
    }
    %c256_i32 = arith.constant 256 : i32
    %3 = arith.muli %arg2, %c256_i32 : i32
    %4 = tpu.assume_multiple %3, 128 : i32
    %5 = arith.index_cast %4 : i32 to index
    %c0 = arith.constant 0 : index
    %6 = vector.load %arg4[%5, %c0] : memref<256x128xf32, #tpu.memory_space<vmem>>, vector<256x128xf32>
    %c0_1 = arith.constant 0 : index
    %c0_2 = arith.constant 0 : index
    %7 = vector.load %arg5[%c0_1, %c0_2] : memref<256x128xf32, #tpu.memory_space<vmem>>, vector<256x128xf32>
    %c0_3 = arith.constant 0 : index
    %c0_4 = arith.constant 0 : index
    %8 = vector.load %arg3[%c0_3, %c0_4] : memref<256x256xf32, #tpu.memory_space<vmem>>, vector<256x256xf32>
    %9 = arith.truncf %8 : vector<256x256xf32> to vector<256x256xbf16>
    %10 = arith.truncf %6 : vector<256x128xf32> to vector<256x128xbf16>
    %cst = arith.constant dense<0.000000e+00> : vector<256x128xf32>
    %11 = tpu.matmul %9, %10, %cst {dimension_numbers = #tpu.dot_dimension_numbers<[1], [0], [0], [1], [0, 0, 1, 1], [], []>} : vector<256x256xbf16>, vector<256x128xbf16>, vector<256x128xf32> -> vector<256x128xf32>
    %12 = arith.addf %7, %11 : vector<256x128xf32>
    %c0_5 = arith.constant 0 : index
    %c0_6 = arith.constant 0 : index
    %13 = vector.load %arg5[%c0_5, %c0_6] : memref<256x128xf32, #tpu.memory_space<vmem>>, vector<256x128xf32>
    tpu.vector_store %arg5[%c0_5, %c0_6], %12 {strides = array<i32>} : memref<256x128xf32, #tpu.memory_space<vmem>>, vector<256x128xf32>,
    return
  }
  func.func @transform_0(%arg0: i32, %arg1: i32, %arg2: i32) -> (i32, i32) {
    %c0_i32 = arith.constant 0 : i32
    return %arg0, %arg2 : i32, i32
  }
  func.func @transform_1(%arg0: i32, %arg1: i32, %arg2: i32) -> (i32, i32) {
    %c0_i32 = arith.constant 0 : i32
    %c0_i32_0 = arith.constant 0 : i32
    return %c0_i32, %arg1 : i32, i32
  }
  func.func @transform_2(%arg0: i32, %arg1: i32, %arg2: i32) -> (i32, i32) {
    %c0_i32 = arith.constant 0 : i32
    return %arg0, %arg1 : i32, i32
  }
}

</mosaic_0001>

<bundles_post_ra>
// kernel: tpu_custom_call.1
= control target key start
LH: loop header
LB: loop body
LE: loop exit
PB: predicated region body
PF: predicated region fallthrough
CT: control target
= control target key end

     0   :  { %7 = vsyncpa [#allocation3], 0  ;;  %s770_s0 = inlined_call_operand.hbm [shape: f32[256,256], index: 0, kind: input, shape index: {}]   ;;  %s771_s1 = inlined_call_operand.hbm [shape: f32[256,128], index: 1, kind: input, shape index: {}]   ;;  %s772_s2 = inlined_call_operand.hbm [shape: f32[256,128], index: 2, kind: output, shape index: {}]  }
   0x1   :  { %8 = vsyncpa [#allocation6], 0 }
   0x2   :  { %9 = vsyncpa [#allocation4], 0  ;;  %s706_s9 = smov [#allocation2]   ;;  %s634_s13 = scalar_lea.hbm %s770_s0, 8192 }
   0x3   :  { %s15_s10 = sshll.u32 %s706_s9, 4  ;;  %p635_p0 = scmp.ne.s32.totalorder %s770_s0, %s634_s13  ;;  %s16_s10 = int_to_ptr.vmem [resolvable:$true] %s15_s10 }
   0x4   :  { %p638_p1 = scmp.lt.u32.totalorder %s634_s13, %s770_s0 }
   0x6   :  { %p640_p2 = pnand %p638_p1, %p635_p0 }
   0x8   :  { %643 = shalt.err (!%p640_p2)
}
   0x9   :  { %s644_s18 = scalar_lea.vmem %s16_s10, 8192  ;;  %p649_p4 = scmp.lt.s32.totalorder %s16_s10, %s16_s10 }
   0xa   :  { %p645_p3 = scmp.ne.s32.totalorder %s16_s10, %s644_s18  ;;  %p650_p5 = scmp.lt.s32.totalorder %s644_s18, %s644_s18 }
   0xc   :  { %p651_p6 = por %p650_p5, %p649_p4 }
   0xe   :  { %p652_p7 = pnand %p651_p6, %p645_p3 }
  0x10   :  { %655 = shalt.err (!%p652_p7)
}
  0x11   :  { %s707_s19 = smov 256   ;;  %s708_s20 = smov 16  }
  0x12   :  { %21 = dma.hbm_to_vmem [thread:$0]  %s770_s0, 8192, %s16_s10, [#allocation3], %s707_s19, %s707_s19, %s708_s20  }
  0x13   :  { %s709_s23 = smov [#allocation5]   ;;  %s656_s27 = scalar_lea.hbm %s771_s1, 4096 }
  0x14   :  { %s27_s24 = sshll.u32 %s709_s23, 4  ;;  %p657_p8 = scmp.ne.s32.totalorder %s771_s1, %s656_s27  ;;  %s28_s24 = int_to_ptr.vmem [resolvable:$true] %s27_s24 }
  0x15   :  { %p660_p9 = scmp.lt.u32.totalorder %s656_s27, %s771_s1 }
  0x17   :  { %p662_p10 = pnand %p660_p9, %p657_p8 }
  0x19   :  { %665 = shalt.err (!%p662_p10)
}
  0x1a   :  { %s666_s4 = scalar_lea.vmem %s28_s24, 4096  ;;  %p671_p12 = scmp.lt.s32.totalorder %s28_s24, %s28_s24 }
  0x1b   :  { %p667_p11 = scmp.ne.s32.totalorder %s28_s24, %s666_s4  ;;  %p672_p13 = scmp.lt.s32.totalorder %s666_s4, %s666_s4 }
  0x1d   :  { %p673_p0 = por %p672_p13, %p671_p12 }
  0x1f   :  { %p674_p1 = pnand %p673_p0, %p667_p11 }
  0x21   :  { %677 = shalt.err (!%p674_p1)
}
  0x22   :  { %s710_s0 = smov 128   ;;  %s711_s5 = smov 8  }
  0x23   :  { %33 = dma.hbm_to_vmem [thread:$0]  %s771_s1, 4096, %s28_s24, [#allocation6], %s710_s0, %s710_s0, %s711_s5  }
  0x24   :  { %700 = dma.done.wait [#allocation3], 8192  }
  0x25   :  { %701 = vsyncadd [#allocation3], 4294959104 }
  0x26   :  { %702 = dma.done.wait [#allocation6], 4096  }
  0x27   :  { %703 = vsyncadd [#allocation6], 4294963200  ;;  %v95_v0 = vld [vmem:[#allocation5 + $0x80] sm:$0xff]  ;;  %v96_v1 = vld [vmem:[#allocation5 + $0x88] sm:$0xff]  ;;  %s712_s1 = smov [#allocation7]  }
  0x28   :  { %v79_v2 = vld [vmem:[#allocation5] sm:$0xff]  ;;  %v247_v3 = vpack.c.bf16 %v96_v1, %v95_v0  ;;  %v80_v4 = vld [vmem:[#allocation5 + $0x8] sm:$0xff]  ;;  %v97_v5 = vld [vmem:[#allocation5 + $0x90] sm:$0xff]  ;;  %s485_s8 = sshll.u32 %s712_s1, 4  ;;  %s486_s8 = int_to_ptr.vmem [resolvable:$true] %s485_s8 }
  0x29   :  { %v98_v6 = vld [vmem:[#allocation5 + $0x98] sm:$0xff]  ;;  %v239_v7 = vpack.c.bf16 %v80_v4, %v79_v2  ;;  %v81_v9 = vld [vmem:[#allocation5 + $0x10] sm:$0xff]  ;;  %v99_v11 = vld [vmem:[#allocation5 + $0xa0] sm:$0xff]  ;;  %s678_s9 = scalar_lea.vmem %s486_s8, 4096  ;;  %p683_p3 = scmp.lt.s32.totalorder %s486_s8, %s486_s8 }
  0x2a   :  { %v248_v8 = vpack.c.bf16 %v98_v6, %v97_v5  ;;  %v82_v10 = vld [vmem:[#allocation5 + $0x18] sm:$0xff]  ;;  %498 = vmatprep.subr.bf16.mxu0 %v247_v3  ;;  %610 = vmatprep.subr.bf16.mxu1 %v247_v3  ;;  %v100_v12 = vld [vmem:[#allocation5 + $0xa8] sm:$0xff]  ;;  %v83_v15 = vld [vmem:[#allocation5 + $0x20] sm:$0xff]  ;;  %p679_p2 = scmp.ne.s32.totalorder %s486_s8, %s678_s9  ;;  %p684_p4 = scmp.lt.s32.totalorder %s678_s9, %s678_s9 }
  0x2b   :  { %499 = vmatpush3.bf16.msra.mxu0 %v239_v7  ;;  %618 = vmatpush3.bf16.msra.mxu1 %v239_v7  ;;  %v240_v13 = vpack.c.bf16 %v82_v10, %v81_v9  ;;  %v249_v14 = vpack.c.bf16 %v100_v12, %v99_v11  ;;  %v84_v16 = vld [vmem:[#allocation5 + $0x28] sm:$0xff]  ;;  %v101_v17 = vld [vmem:[#allocation5 + $0xb0] sm:$0xff]  ;;  %v102_v18 = vld [vmem:[#allocation5 + $0xb8] sm:$0xff] }
  0x2c   :  { %500 = vmatprep.subr.bf16.mxu0 %v248_v8  ;;  %611 = vmatprep.subr.bf16.mxu1 %v248_v8  ;;  %v241_v19 = vpack.c.bf16 %v84_v16, %v83_v15  ;;  %v250_v20 = vpack.c.bf16 %v102_v18, %v101_v17  ;;  %v85_v21 = vld [vmem:[#allocation5 + $0x30] sm:$0xff]  ;;  %v86_v22 = vld [vmem:[#allocation5 + $0x38] sm:$0xff]  ;;  %v103_v23 = vld [vmem:[#allocation5 + $0xc0] sm:$0xff]  ;;  %p685_p5 = por %p684_p4, %p683_p3 }
  0x2d   :  { %v104_v24 = vld [vmem:[#allocation5 + $0xc8] sm:$0xff]  ;;  %v146_v26 = vld [vmem:[#allocation2 + $0x18] sm:$0xff]  ;;  %v242_v29 = vpack.c.bf16 %v86_v22, %v85_v21  ;;  %v87_v33 = vld [vmem:[#allocation5 + $0x40] sm:$0xff] }
  0x2e   :  { %v144_v25 = vld [vmem:[#allocation2 + $0x8] sm:$0xff]  ;;  %v178_v28 = vld [vmem:[#allocation2 + $0x118] sm:$0xff]  ;;  %v251_v32 = vpack.c.bf16 %v104_v24, %v103_v23  ;;  %v105_v35 = vld [vmem:[#allocation5 + $0xd0] sm:$0xff]  ;;  %p686_p6 = pnand %p685_p5, %p679_p2 }
  0x2f   :  { %501 = vmatpush3.bf16.msra.mxu0 %v240_v13  ;;  %619 = vmatpush3.bf16.msra.mxu1 %v240_v13  ;;  %v176_v27 = vld [vmem:[#allocation2 + $0x108] sm:$0xff]  ;;  %v208_v30 = vpack.c.bf16 %v146_v26, %v144_v25  ;;  %v106_v36 = vld [vmem:[#allocation5 + $0xd8] sm:$0xff]  ;;  %v89_v39 = vld [vmem:[#allocation5 + $0x50] sm:$0xff] }
  0x30   :  { %502 = vmatprep.subr.bf16.mxu0 %v249_v14  ;;  %612 = vmatprep.subr.bf16.mxu1 %v249_v14  ;;  %v224_v31 = vpack.c.bf16 %v178_v28, %v176_v27  ;;  %v88_v34 = vld [vmem:[#allocation5 + $0x48] sm:$0xff]  ;;  %v252_v38 = vpack.c.bf16 %v106_v36, %v105_v35  ;;  %v90_v40 = vld [vmem:[#allocation5 + $0x58] sm:$0xff]  ;;  %v107_v41 = vld [vmem:[#allocation5 + $0xe0] sm:$0xff] }
  0x31   :  { %287 = vmatprep.mubr.bf16.mxu0 %v208_v30  ;;  %v243_v37 = vpack.c.bf16 %v88_v34, %v87_v33  ;;  %v108_v42 = vld [vmem:[#allocation5 + $0xe8] sm:$0xff]  ;;  %v244_v43 = vpack.c.bf16 %v90_v40, %v89_v39  ;;  %v91_v45 = vld [vmem:[#allocation5 + $0x60] sm:$0xff]  ;;  %v109_v47 = vld [vmem:[#allocation5 + $0xf0] sm:$0xff] }
  0x32   :  { %351 = vmatprep.mubr.bf16.mxu1 %v224_v31  ;;  %v253_v44 = vpack.c.bf16 %v108_v42, %v107_v41  ;;  %v92_v46 = vld [vmem:[#allocation5 + $0x68] sm:$0xff]  ;;  %v110_v48 = vld [vmem:[#allocation5 + $0xf8] sm:$0xff]  ;;  %v93_v51 = vld [vmem:[#allocation5 + $0x70] sm:$0xff] }
  0x33   :  { %503 = vmatpush3.bf16.msra.mxu0 %v241_v19  ;;  %620 = vmatpush3.bf16.msra.mxu1 %v241_v19  ;;  %v245_v49 = vpack.c.bf16 %v92_v46, %v91_v45  ;;  %v254_v50 = vpack.c.bf16 %v110_v48, %v109_v47  ;;  %v94_v52 = vld [vmem:[#allocation5 + $0x78] sm:$0xff]  ;;  %v143_v53 = vld [vmem:[#allocation2] sm:$0xff]  ;;  %v145_v54 = vld [vmem:[#allocation2 + $0x10] sm:$0xff] }
  0x34   :  { %504 = vmatprep.subr.bf16.mxu0 %v250_v20  ;;  %613 = vmatprep.subr.bf16.mxu1 %v250_v20  ;;  %v246_v55 = vpack.c.bf16 %v94_v52, %v93_v51  ;;  %v175_v56 = vld [vmem:[#allocation2 + $0x100] sm:$0xff]  ;;  %v177_v57 = vld [vmem:[#allocation2 + $0x110] sm:$0xff]  ;;  %v148_v58 = vld [vmem:[#allocation2 + $0x28] sm:$0xff]  ;;  %v207_v62 = vpack.c.bf16 %v145_v54, %v143_v53 }
  0x35   :  { %v150_v59 = vld [vmem:[#allocation2 + $0x38] sm:$0xff]  ;;  %v180_v60 = vld [vmem:[#allocation2 + $0x128] sm:$0xff]  ;;  %v223_v63 = vpack.c.bf16 %v177_v57, %v175_v56  ;;  %v147_v2 = vld [vmem:[#allocation2 + $0x20] sm:$0xff] }
  0x36   :  { %v182_v61 = vld [vmem:[#allocation2 + $0x138] sm:$0xff]  ;;  %v210_v0 = vpack.c.bf16 %v150_v59, %v148_v58  ;;  %v149_v3 = vld [vmem:[#allocation2 + $0x30] sm:$0xff]  ;;  %v179_v4 = vld [vmem:[#allocation2 + $0x120] sm:$0xff] }
  0x37   :  { %505 = vmatpush3.bf16.msra.mxu0 %v242_v29  ;;  %621 = vmatpush3.bf16.msra.mxu1 %v242_v29  ;;  %v226_v1 = vpack.c.bf16 %v182_v61, %v180_v60  ;;  %v181_v5 = vld [vmem:[#allocation2 + $0x130] sm:$0xff]  ;;  %v152_v6 = vld [vmem:[#allocation2 + $0x48] sm:$0xff]  ;;  %v154_v7 = vld [vmem:[#allocation2 + $0x58] sm:$0xff]  ;;  %v209_v10 = vpack.c.bf16 %v149_v3, %v147_v2 }
  0x38   :  { %506 = vmatprep.subr.bf16.mxu0 %v251_v32  ;;  %614 = vmatprep.subr.bf16.mxu1 %v251_v32  ;;  %v184_v8 = vld [vmem:[#allocation2 + $0x148] sm:$0xff]  ;;  %v186_v9 = vld [vmem:[#allocation2 + $0x158] sm:$0xff]  ;;  %v225_v11 = vpack.c.bf16 %v181_v5, %v179_v4  ;;  %v212_v12 = vpack.c.bf16 %v154_v7, %v152_v6  ;;  %v151_v14 = vld [vmem:[#allocation2 + $0x40] sm:$0xff] }
  0x39   :  { %v228_v13 = vpack.c.bf16 %v186_v9, %v184_v8  ;;  %v153_v15 = vld [vmem:[#allocation2 + $0x50] sm:$0xff]  ;;  %v183_v16 = vld [vmem:[#allocation2 + $0x140] sm:$0xff]  ;;  %v156_v18 = vld [vmem:[#allocation2 + $0x68] sm:$0xff] }
  0x3a   :  { %v185_v17 = vld [vmem:[#allocation2 + $0x150] sm:$0xff]  ;;  %v158_v19 = vld [vmem:[#allocation2 + $0x78] sm:$0xff]  ;;  %v188_v20 = vld [vmem:[#allocation2 + $0x168] sm:$0xff]  ;;  %v211_v22 = vpack.c.bf16 %v153_v15, %v151_v14 }
  0x3b   :  { %507 = vmatpush3.bf16.msra.mxu0 %v243_v37  ;;  %622 = vmatpush3.bf16.msra.mxu1 %v243_v37  ;;  %v190_v21 = vld [vmem:[#allocation2 + $0x178] sm:$0xff]  ;;  %v227_v23 = vpack.c.bf16 %v185_v17, %v183_v16  ;;  %v214_v24 = vpack.c.bf16 %v158_v19, %v156_v18  ;;  %v155_v26 = vld [vmem:[#allocation2 + $0x60] sm:$0xff]  ;;  %v157_v27 = vld [vmem:[#allocation2 + $0x70] sm:$0xff] }
  0x3c   :  { %508 = vmatprep.subr.bf16.mxu0 %v252_v38  ;;  %615 = vmatprep.subr.bf16.mxu1 %v252_v38  ;;  %v230_v25 = vpack.c.bf16 %v190_v21, %v188_v20  ;;  %v187_v28 = vld [vmem:[#allocation2 + $0x160] sm:$0xff]  ;;  %v189_v29 = vld [vmem:[#allocation2 + $0x170] sm:$0xff]  ;;  %v160_v30 = vld [vmem:[#allocation2 + $0x88] sm:$0xff]  ;;  %v213_v34 = vpack.c.bf16 %v157_v27, %v155_v26 }
  0x3d   :  { %v162_v31 = vld [vmem:[#allocation2 + $0x98] sm:$0xff]  ;;  %v192_v32 = vld [vmem:[#allocation2 + $0x188] sm:$0xff]  ;;  %v229_v35 = vpack.c.bf16 %v189_v29, %v187_v28  ;;  %v159_v38 = vld [vmem:[#allocation2 + $0x80] sm:$0xff] }
  0x3e   :  { %v194_v33 = vld [vmem:[#allocation2 + $0x198] sm:$0xff]  ;;  %v216_v36 = vpack.c.bf16 %v162_v31, %v160_v30  ;;  %v161_v39 = vld [vmem:[#allocation2 + $0x90] sm:$0xff]  ;;  %v191_v40 = vld [vmem:[#allocation2 + $0x180] sm:$0xff] }
  0x3f   :  { %509 = vmatpush3.bf16.msra.mxu0 %v244_v43  ;;  %623 = vmatpush3.bf16.msra.mxu1 %v244_v43  ;;  %v232_v37 = vpack.c.bf16 %v194_v33, %v192_v32  ;;  %v193_v41 = vld [vmem:[#allocation2 + $0x190] sm:$0xff]  ;;  %v164_v42 = vld [vmem:[#allocation2 + $0xa8] sm:$0xff]  ;;  %v166_v43 = vld [vmem:[#allocation2 + $0xb8] sm:$0xff]  ;;  %v215_v46 = vpack.c.bf16 %v161_v39, %v159_v38 }
  0x40   :  { %510 = vmatprep.subr.bf16.mxu0 %v253_v44  ;;  %616 = vmatprep.subr.bf16.mxu1 %v253_v44  ;;  %v196_v44 = vld [vmem:[#allocation2 + $0x1a8] sm:$0xff]  ;;  %v198_v45 = vld [vmem:[#allocation2 + $0x1b8] sm:$0xff]  ;;  %v231_v47 = vpack.c.bf16 %v193_v41, %v191_v40  ;;  %v218_v48 = vpack.c.bf16 %v166_v43, %v164_v42  ;;  %v165_v51 = vld [vmem:[#allocation2 + $0xb0] sm:$0xff] }
  0x41   :  { %v195_v52 = vld [vmem:[#allocation2 + $0x1a0] sm:$0xff]  ;;  %v197_v53 = vld [vmem:[#allocation2 + $0x1b0] sm:$0xff]  ;;  %v168_v54 = vld [vmem:[#allocation2 + $0xc8] sm:$0xff] }
  0x42   :  { %v200_v56 = vld [vmem:[#allocation2 + $0x1c8] sm:$0xff]  ;;  %v202_v57 = vld [vmem:[#allocation2 + $0x1d8] sm:$0xff]  ;;  %v233_v59 = vpack.c.bf16 %v197_v53, %v195_v52 }
  0x43   :  { %511 = vmatpush3.bf16.msra.mxu0 %v245_v49  ;;  %624 = vmatpush3.bf16.msra.mxu1 %v245_v49  ;;  %v234_v49 = vpack.c.bf16 %v198_v45, %v196_v44  ;;  %v236_v61 = vpack.c.bf16 %v202_v57, %v200_v56  ;;  %v172_v2 = vld [vmem:[#allocation2 + $0xe8] sm:$0xff]  ;;  %v174_v3 = vld [vmem:[#allocation2 + $0xf8] sm:$0xff] }
  0x44   :  { %512 = vmatprep.subr.bf16.mxu0 %v254_v50  ;;  %617 = vmatprep.subr.bf16.mxu1 %v254_v50  ;;  %v163_v50 = vld [vmem:[#allocation2 + $0xa0] sm:$0xff]  ;;  %v204_v4 = vld [vmem:[#allocation2 + $0x1e8] sm:$0xff]  ;;  %v206_v5 = vld [vmem:[#allocation2 + $0x1f8] sm:$0xff]  ;;  %v222_v8 = vpack.c.bf16 %v174_v3, %v172_v2 }
  0x45   :  { %v217_v58 = vpack.c.bf16 %v165_v51, %v163_v50  ;;  %v238_v9 = vpack.c.bf16 %v206_v5, %v204_v4 }
  0x47   :  { %513 = vmatpush3.bf16.msra.mxu0 %v246_v55  ;;  %625 = vmatpush3.bf16.msra.mxu1 %v246_v55  ;;  %v170_v55 = vld [vmem:[#allocation2 + $0xd8] sm:$0xff] }
  0x48   :  { %v220_v60 = vpack.c.bf16 %v170_v55, %v168_v54 }
  0x4a   :  { %288 = vmatmul.mubr.bf16.vlgmr.msra.gmra.mrb[0].mxu0 %v207_v62  ;;  %352 = vmatmul.mubr.bf16.vlgmr.msra.gmra.mrb[0].mxu1 %v223_v63  ;;  %v167_v62 = vld [vmem:[#allocation2 + $0xc0] sm:$0xff]  ;;  %v169_v63 = vld [vmem:[#allocation2 + $0xd0] sm:$0xff] }
  0x4b   :  { %295 = vmatprep.mubr.bf16.mxu0 %v210_v0  ;;  %359 = vmatprep.mubr.bf16.mxu1 %v226_v1  ;;  %v199_v0 = vld [vmem:[#allocation2 + $0x1c0] sm:$0xff]  ;;  %v201_v1 = vld [vmem:[#allocation2 + $0x1d0] sm:$0xff]  ;;  %v219_v6 = vpack.c.bf16 %v169_v63, %v167_v62 }
  0x4c   :  { %v235_v7 = vpack.c.bf16 %v201_v1, %v199_v0 }
  0x52   :  { %296 = vmatmul.mubr.bf16.gmra.mrb[4].mxu0 %v209_v10  ;;  %360 = vmatmul.mubr.bf16.gmra.mrb[4].mxu1 %v225_v11  ;;  %v171_v10 = vld [vmem:[#allocation2 + $0xe0] sm:$0xff]  ;;  %v173_v11 = vld [vmem:[#allocation2 + $0xf0] sm:$0xff] }
  0x53   :  { %303 = vmatprep.mubr.bf16.mxu0 %v212_v12  ;;  %367 = vmatprep.mubr.bf16.mxu1 %v228_v13  ;;  %v203_v12 = vld [vmem:[#allocation2 + $0x1e0] sm:$0xff]  ;;  %v205_v13 = vld [vmem:[#allocation2 + $0x1f0] sm:$0xff]  ;;  %v221_v14 = vpack.c.bf16 %v173_v11, %v171_v10 }
  0x54   :  { %v237_v15 = vpack.c.bf16 %v205_v13, %v203_v12 }
  0x5a   :  { %304 = vmatmul.mubr.bf16.gmra.mrb[8].mxu0 %v211_v22  ;;  %368 = vmatmul.mubr.bf16.gmra.mrb[8].mxu1 %v227_v23 }
  0x5b   :  { %311 = vmatprep.mubr.bf16.mxu0 %v214_v24  ;;  %375 = vmatprep.mubr.bf16.mxu1 %v230_v25 }
  0x62   :  { %312 = vmatmul.mubr.bf16.gmra.mrb[12].mxu0 %v213_v34  ;;  %376 = vmatmul.mubr.bf16.gmra.mrb[12].mxu1 %v229_v35 }
  0x63   :  { %319 = vmatprep.mubr.bf16.mxu0 %v216_v36  ;;  %383 = vmatprep.mubr.bf16.mxu1 %v232_v37 }
  0x6a   :  { %320 = vmatmul.mubr.bf16.gmra.mrb[16].mxu0 %v215_v46  ;;  %384 = vmatmul.mubr.bf16.gmra.mrb[16].mxu1 %v231_v47 }
  0x6b   :  { %327 = vmatprep.mubr.bf16.mxu0 %v218_v48  ;;  %391 = vmatprep.mubr.bf16.mxu1 %v234_v49 }
  0x72   :  { %328 = vmatmul.mubr.bf16.gmra.mrb[20].mxu0 %v217_v58  ;;  %392 = vmatmul.mubr.bf16.gmra.mrb[20].mxu1 %v233_v59 }
  0x73   :  { %335 = vmatprep.mubr.bf16.mxu0 %v220_v60  ;;  %399 = vmatprep.mubr.bf16.mxu1 %v236_v61 }
  0x7a   :  { %336 = vmatmul.mubr.bf16.gmra.mrb[24].mxu0 %v219_v6  ;;  %400 = vmatmul.mubr.bf16.gmra.mrb[24].mxu1 %v235_v7 }
  0x7b   :  { %343 = vmatprep.mubr.bf16.mxu0 %v222_v8  ;;  %407 = vmatprep.mubr.bf16.mxu1 %v238_v9 }
  0x82   :  { %344 = vmatmul.mubr.bf16.gmra.mrb[28].mxu0 %v221_v14  ;;  %408 = vmatmul.mubr.bf16.gmra.mrb[28].mxu1 %v237_v15 }
 0x11d   :  { %v514_v16 = vpop.f32.mrb[0].mxu0  ;;  %v562_v17 = vpop.f32.mrb[0].mxu1 }
 0x11e   :  { %v515_v18 = vpop.f32.mrb[1].mxu0  ;;  %v563_v19 = vpop.f32.mrb[1].mxu1 }
 0x11f   :  { %v516_v20 = vadd.f32 %v515_v18, %v514_v16  ;;  %v564_v21 = vadd.f32 %v563_v19, %v562_v17  ;;  %v517_v22 = vpop.f32.mrb[2].mxu0  ;;  %v565_v23 = vpop.f32.mrb[2].mxu1 }
 0x120   :  { %v518_v24 = vpop.f32.mrb[3].mxu0  ;;  %v566_v25 = vpop.f32.mrb[3].mxu1 }
 0x121   :  { %v519_v26 = vadd.f32 %v518_v24, %v517_v22  ;;  %v567_v27 = vadd.f32 %v566_v25, %v565_v23  ;;  %448 = vst [vmem:[#allocation7] sm:$0xff] %v516_v20  ;;  %464 = vst [vmem:[#allocation7 + $0x80] sm:$0xff] %v564_v21 }
 0x123   :  { %449 = vst [vmem:[#allocation7 + $0x8] sm:$0xff] %v519_v26  ;;  %465 = vst [vmem:[#allocation7 + $0x88] sm:$0xff] %v567_v27 }
 0x125   :  { %v520_v28 = vpop.f32.mrb[4].mxu0  ;;  %v568_v29 = vpop.f32.mrb[4].mxu1 }
 0x126   :  { %v521_v30 = vpop.f32.mrb[5].mxu0  ;;  %v569_v31 = vpop.f32.mrb[5].mxu1 }
 0x127   :  { %v522_v32 = vadd.f32 %v521_v30, %v520_v28  ;;  %v570_v33 = vadd.f32 %v569_v31, %v568_v29  ;;  %v523_v34 = vpop.f32.mrb[6].mxu0  ;;  %v571_v35 = vpop.f32.mrb[6].mxu1 }
 0x128   :  { %v524_v36 = vpop.f32.mrb[7].mxu0  ;;  %v572_v37 = vpop.f32.mrb[7].mxu1 }
 0x129   :  { %v525_v38 = vadd.f32 %v524_v36, %v523_v34  ;;  %v573_v39 = vadd.f32 %v572_v37, %v571_v35  ;;  %450 = vst [vmem:[#allocation7 + $0x10] sm:$0xff] %v522_v32  ;;  %466 = vst [vmem:[#allocation7 + $0x90] sm:$0xff] %v570_v33 }
 0x12b   :  { %451 = vst [vmem:[#allocation7 + $0x18] sm:$0xff] %v525_v38  ;;  %467 = vst [vmem:[#allocation7 + $0x98] sm:$0xff] %v573_v39 }
 0x12d   :  { %v526_v40 = vpop.f32.mrb[8].mxu0  ;;  %v574_v41 = vpop.f32.mrb[8].mxu1 }
 0x12e   :  { %v527_v42 = vpop.f32.mrb[9].mxu0  ;;  %v575_v43 = vpop.f32.mrb[9].mxu1 }
 0x12f   :  { %v528_v44 = vadd.f32 %v527_v42, %v526_v40  ;;  %v576_v45 = vadd.f32 %v575_v43, %v574_v41  ;;  %v529_v46 = vpop.f32.mrb[10].mxu0  ;;  %v577_v47 = vpop.f32.mrb[10].mxu1 }
 0x130   :  { %v530_v48 = vpop.f32.mrb[11].mxu0  ;;  %v578_v49 = vpop.f32.mrb[11].mxu1 }
 0x131   :  { %v531_v50 = vadd.f32 %v530_v48, %v529_v46  ;;  %v579_v51 = vadd.f32 %v578_v49, %v577_v47  ;;  %452 = vst [vmem:[#allocation7 + $0x20] sm:$0xff] %v528_v44  ;;  %468 = vst [vmem:[#allocation7 + $0xa0] sm:$0xff] %v576_v45 }
 0x133   :  { %453 = vst [vmem:[#allocation7 + $0x28] sm:$0xff] %v531_v50  ;;  %469 = vst [vmem:[#allocation7 + $0xa8] sm:$0xff] %v579_v51 }
 0x135   :  { %v532_v52 = vpop.f32.mrb[12].mxu0  ;;  %v580_v53 = vpop.f32.mrb[12].mxu1 }
 0x136   :  { %v533_v54 = vpop.f32.mrb[13].mxu0  ;;  %v581_v55 = vpop.f32.mrb[13].mxu1 }
 0x137   :  { %v534_v56 = vadd.f32 %v533_v54, %v532_v52  ;;  %v582_v57 = vadd.f32 %v581_v55, %v580_v53  ;;  %v535_v58 = vpop.f32.mrb[14].mxu0  ;;  %v583_v59 = vpop.f32.mrb[14].mxu1 }
 0x138   :  { %v536_v60 = vpop.f32.mrb[15].mxu0  ;;  %v584_v61 = vpop.f32.mrb[15].mxu1 }
 0x139   :  { %v537_v62 = vadd.f32 %v536_v60, %v535_v58  ;;  %v585_v63 = vadd.f32 %v584_v61, %v583_v59  ;;  %454 = vst [vmem:[#allocation7 + $0x30] sm:$0xff] %v534_v56  ;;  %470 = vst [vmem:[#allocation7 + $0xb0] sm:$0xff] %v582_v57 }
 0x13b   :  { %455 = vst [vmem:[#allocation7 + $0x38] sm:$0xff] %v537_v62  ;;  %471 = vst [vmem:[#allocation7 + $0xb8] sm:$0xff] %v585_v63 }
 0x13d   :  { %v538_v0 = vpop.f32.mrb[16].mxu0  ;;  %v586_v1 = vpop.f32.mrb[16].mxu1 }
 0x13e   :  { %v539_v2 = vpop.f32.mrb[17].mxu0  ;;  %v587_v3 = vpop.f32.mrb[17].mxu1 }
 0x13f   :  { %v540_v4 = vadd.f32 %v539_v2, %v538_v0  ;;  %v588_v5 = vadd.f32 %v587_v3, %v586_v1  ;;  %v541_v6 = vpop.f32.mrb[18].mxu0  ;;  %v589_v7 = vpop.f32.mrb[18].mxu1 }
 0x140   :  { %v542_v8 = vpop.f32.mrb[19].mxu0  ;;  %v590_v9 = vpop.f32.mrb[19].mxu1 }
 0x141   :  { %v543_v10 = vadd.f32 %v542_v8, %v541_v6  ;;  %v591_v11 = vadd.f32 %v590_v9, %v589_v7  ;;  %456 = vst [vmem:[#allocation7 + $0x40] sm:$0xff] %v540_v4  ;;  %472 = vst [vmem:[#allocation7 + $0xc0] sm:$0xff] %v588_v5 }
 0x143   :  { %457 = vst [vmem:[#allocation7 + $0x48] sm:$0xff] %v543_v10  ;;  %473 = vst [vmem:[#allocation7 + $0xc8] sm:$0xff] %v591_v11 }
 0x145   :  { %v544_v12 = vpop.f32.mrb[20].mxu0  ;;  %v592_v13 = vpop.f32.mrb[20].mxu1 }
 0x146   :  { %v545_v14 = vpop.f32.mrb[21].mxu0  ;;  %v593_v15 = vpop.f32.mrb[21].mxu1 }
 0x147   :  { %v546_v16 = vadd.f32 %v545_v14, %v544_v12  ;;  %v594_v17 = vadd.f32 %v593_v15, %v592_v13  ;;  %v547_v18 = vpop.f32.mrb[22].mxu0  ;;  %v595_v19 = vpop.f32.mrb[22].mxu1 }
 0x148   :  { %v548_v20 = vpop.f32.mrb[23].mxu0  ;;  %v596_v21 = vpop.f32.mrb[23].mxu1 }
 0x149   :  { %v549_v22 = vadd.f32 %v548_v20, %v547_v18  ;;  %v597_v23 = vadd.f32 %v596_v21, %v595_v19  ;;  %458 = vst [vmem:[#allocation7 + $0x50] sm:$0xff] %v546_v16  ;;  %474 = vst [vmem:[#allocation7 + $0xd0] sm:$0xff] %v594_v17 }
 0x14b   :  { %459 = vst [vmem:[#allocation7 + $0x58] sm:$0xff] %v549_v22  ;;  %475 = vst [vmem:[#allocation7 + $0xd8] sm:$0xff] %v597_v23 }
 0x14d   :  { %v550_v24 = vpop.f32.mrb[24].mxu0  ;;  %v598_v25 = vpop.f32.mrb[24].mxu1 }
 0x14e   :  { %v551_v26 = vpop.f32.mrb[25].mxu0  ;;  %v599_v27 = vpop.f32.mrb[25].mxu1 }
 0x14f   :  { %v552_v28 = vadd.f32 %v551_v26, %v550_v24  ;;  %v600_v29 = vadd.f32 %v599_v27, %v598_v25  ;;  %v553_v30 = vpop.f32.mrb[26].mxu0  ;;  %v601_v31 = vpop.f32.mrb[26].mxu1 }
 0x150   :  { %v554_v32 = vpop.f32.mrb[27].mxu0  ;;  %v602_v33 = vpop.f32.mrb[27].mxu1 }
 0x151   :  { %v555_v34 = vadd.f32 %v554_v32, %v553_v30  ;;  %v603_v35 = vadd.f32 %v602_v33, %v601_v31  ;;  %460 = vst [vmem:[#allocation7 + $0x60] sm:$0xff] %v552_v28  ;;  %476 = vst [vmem:[#allocation7 + $0xe0] sm:$0xff] %v600_v29 }
 0x153   :  { %461 = vst [vmem:[#allocation7 + $0x68] sm:$0xff] %v555_v34  ;;  %477 = vst [vmem:[#allocation7 + $0xe8] sm:$0xff] %v603_v35 }
 0x155   :  { %v556_v36 = vpop.f32.mrb[28].mxu0  ;;  %v604_v37 = vpop.f32.mrb[28].mxu1 }
 0x156   :  { %v557_v38 = vpop.f32.mrb[29].mxu0  ;;  %v605_v39 = vpop.f32.mrb[29].mxu1 }
 0x157   :  { %v558_v40 = vadd.f32 %v557_v38, %v556_v36  ;;  %v606_v41 = vadd.f32 %v605_v39, %v604_v37  ;;  %v559_v42 = vpop.f32.mrb[30].mxu0  ;;  %v607_v43 = vpop.f32.mrb[30].mxu1 }
 0x158   :  { %v560_v44 = vpop.f32.mrb[31].mxu0  ;;  %v608_v45 = vpop.f32.mrb[31].mxu1 }
 0x159   :  { %v561_v46 = vadd.f32 %v560_v44, %v559_v42  ;;  %v609_v47 = vadd.f32 %v608_v45, %v607_v43  ;;  %462 = vst [vmem:[#allocation7 + $0x70] sm:$0xff] %v558_v40  ;;  %478 = vst [vmem:[#allocation7 + $0xf0] sm:$0xff] %v606_v41 }
 0x15b   :  { %463 = vst [vmem:[#allocation7 + $0x78] sm:$0xff] %v561_v46  ;;  %479 = vst [vmem:[#allocation7 + $0xf8] sm:$0xff] %v609_v47 }
 0x15c   :  { %689 = shalt.err (!%p686_p6)
}
 0x15d   :  { %s690_s12 = scalar_lea.hbm %s772_s2, 4096 }
 0x15e   :  { %p691_p7 = scmp.ne.s32.totalorder %s772_s2, %s690_s12  ;;  %p694_p8 = scmp.lt.u32.totalorder %s690_s12, %s772_s2 }
 0x160   :  { %p696_p9 = pnand %p694_p8, %p691_p7 }
 0x162   :  { %699 = shalt.err (!%p696_p9)
}
 0x163   :  { %491 = dma.vmem_to_hbm [thread:$0]  %s486_s8, 4096, %s772_s2, [#allocation4], %s710_s0, %s710_s0, %s711_s5  }
 0x164   :  { %704 = dma.done.wait [#allocation4], 4096  }
 0x165   :  { %705 = vsyncadd [#allocation4], 4294963200 }
 0x166   :  { %495 = vsyncpa [#allocation3], 1 }
 0x167   :  { %496 = vsyncpa [#allocation6], 1 }
 0x168   :  { %497 = vsyncpa [#allocation4], 1 }

</bundles_post_ra>
